<compile_context>
chip_gen: v7x
topology: tpu7x:2x2x1
jax: 0.10.0
libtpu: 0.0.40
codegen_flags: <defaults>
</compile_context>

<pallas_src>
import numpy as np
import jax
import jax.numpy as jnp
from jax.experimental import pallas as pl
from jax.experimental.pallas import tpu as pltpu


def _choose_block_b(B, Cin, Cout, P, r1, vmem_budget_bytes=24 * 1024 * 1024):
    """Largest batch block TB (divisor of B) that fits the VMEM budget, preferring >=2 grid steps."""
    per_elem = 2 * (Cin + Cout) * P * 4                 # double-buffered x + out, f32
    resident = 2 * (r1 * Cout * P + r1 * P) * 4         # a2 + t1_bias (count 2x for safety)
    cap = max(1, (vmem_budget_bytes - resident) // per_elem)
    divisors = [d for d in range(1, B + 1) if B % d == 0 and d <= cap] or [1]
    multi = [d for d in divisors if B // d >= 2]        # keep both v7x TensorCores busy
    return max(multi) if multi else max(divisors)


def _make_kernel(r1, cin, tb, has_bias, use_vpu):
    """Kernel over one (TB, Cin, P) batch block -> (TB, Cout, P) output block."""

    if use_vpu:
        # w0t is in SMEM: the (r1, Cin) contraction becomes r1*Cin scalar-broadcast FMAs on
        # the VPU — no MXU weight-push/pop round-trip for a <1%-utilized matmul.
        def kernel(*refs):
            if has_bias:
                x_ref, w0t_ref, a_ref, bias_ref, o_ref = refs
            else:
                x_ref, w0t_ref, a_ref, o_ref = refs
            x = x_ref[...]                                  # (TB, Cin, P)
            a = a_ref[...]                                  # (r1, Cout, P)
            xb = [x[:, b, :] for b in range(cin)]           # each (TB, P)
            t1 = []
            for g in range(r1):                             # static unroll (tiny TT rank)
                acc = w0t_ref[g, 0] * xb[0]
                for b in range(1, cin):
                    acc = acc + w0t_ref[g, b] * xb[b]
                t1.append(acc)                              # (TB, P) f32
            if has_bias:
                bias = bias_ref[...]                        # (r1, P) hoisted temb injection
                t1 = [t1[g] + bias[g:g + 1, :] for g in range(r1)]
            # rank combine: out[t,e,p] = sum_g t1[g][t,p] * a2[g][e,p]
            out = t1[0][:, None, :] * a[0][None, :, :]
            for g in range(1, r1):
                out = out + t1[g][:, None, :] * a[g][None, :, :]
            o_ref[...] = out.astype(o_ref.dtype)            # one lane-dense (TB,Cout,P) store
        return kernel

    # MXU fallback for larger Cin: per-element 2-D matmul inside the block.
    def kernel(*refs):
        if has_bias:
            x_ref, w0t_ref, a_ref, bias_ref, o_ref = refs
        else:
            x_ref, w0t_ref, a_ref, o_ref = refs
        w0t = w0t_ref[...]                                  # (r1, Cin) in VMEM
        a = a_ref[...]                                      # (r1, Cout, P)
        bias = bias_ref[...] if has_bias else None

        @pl.loop(0, tb)
        def _(t):
            xe = x_ref[t]                                   # (Cin, P)
            t1 = jnp.dot(w0t, xe, preferred_element_type=jnp.float32)   # (r1, P)
            if has_bias:
                t1 = t1 + bias
            out = t1[0:1, :] * a[0]
            for g in range(1, r1):
                out = out + t1[g:g + 1, :] * a[g]
            o_ref[t] = out.astype(o_ref.dtype)
    return kernel


def contract_tt_forward(x, tt_factors, temb=None, dense_w=None, dense_b=None):
    """Forward pass of contract_tt for a 4-D NCHW input (separable=False)."""
    B, Cin, H, W = x.shape
    f0, f1, f2, f3 = tt_factors
    r1 = f0.shape[2]
    Cout = f1.shape[1]
    assert f0.shape[1] == Cin and f2.shape[1] == H and f3.shape[1] == W
    P = H * W
    P_pad = ((P + 127) // 128) * 128                       # lane-dense last axis

    # ---- parameter-only preprocessing (plain JAX, grid-invariant) ----
    w0t = jnp.einsum('fbg->gb', f0).astype(jnp.float32)                       # (r1, Cin)
    a2 = jnp.einsum('geh,hci,idj->gecd', f1, f2, f3).reshape(r1, Cout, P)
    a2 = a2.astype(jnp.float32)
    x2 = x.reshape(B, Cin, P).astype(jnp.float32)

    has_temb = temb is not None
    t1_bias = None
    if has_temb:
        Bt, tin = temb.shape
        hidden = dense_w.shape[0]
        assert tin == Cin and dense_w.shape[1] == tin
        assert hidden == W and Bt in (Cin, 1), (
            "PyTorch broadcast `x + Dense_0(act(temb))[:, None]` requires "
            "Dense_0 hidden == W and temb batch in {Cin, 1}")
        # Hoisted, grid-invariant injection:  w0t @ (x + inj) = w0t @ x + t1_bias.
        inj = jax.nn.silu(temb) @ dense_w.T + dense_b                         # (Bt, W)
        inj = jnp.broadcast_to(inj, (Cin, W))                                 # Bt==1 broadcast
        t1_bias_w = jnp.dot(w0t, inj)                                         # (r1, W)
        t1_bias = jnp.tile(t1_bias_w[:, None, :], (1, H, 1)).reshape(r1, P)
        t1_bias = t1_bias.astype(jnp.float32)

    if P_pad != P:
        pad = P_pad - P
        x2 = jnp.pad(x2, ((0, 0), (0, 0), (0, pad)))
        a2 = jnp.pad(a2, ((0, 0), (0, 0), (0, pad)))
        if has_temb:
            t1_bias = jnp.pad(t1_bias, ((0, 0), (0, pad)))

    TB = _choose_block_b(B, Cin, Cout, P_pad, r1)
    grid = (B // TB,)
    use_vpu = (r1 * Cin <= 64)                              # tiny TT rank / channel count

    kernel = _make_kernel(r1, Cin, TB, has_temb, use_vpu)

    x_spec = pl.BlockSpec((TB, Cin, P_pad), lambda i: (i, 0, 0))
    a_spec = pl.BlockSpec((r1, Cout, P_pad), lambda i: (0, 0, 0))
    o_spec = pl.BlockSpec((TB, Cout, P_pad), lambda i: (i, 0, 0))
    if use_vpu:
        w0t_spec = pl.BlockSpec(memory_space=pltpu.MemorySpace.SMEM)          # scalars
    else:
        w0t_spec = pl.BlockSpec((r1, Cin), lambda i: (0, 0))

    in_specs = [x_spec, w0t_spec, a_spec]
    args = [x2, w0t, a2]
    if has_temb:
        in_specs.append(pl.BlockSpec((r1, P_pad), lambda i: (0, 0)))
        args.append(t1_bias)

    flops = 2 * B * r1 * (Cin + Cout) * P_pad
    bytes_accessed = 4 * (B * (Cin + Cout) * P_pad + r1 * Cout * P_pad
                          + r1 * Cin + r1 * P_pad)
    cost = pl.CostEstimate(flops=flops, transcendentals=0,
                           bytes_accessed=bytes_accessed)

    out2 = pl.pallas_call(
        kernel,
        out_shape=jax.ShapeDtypeStruct((B, Cout, P_pad), x.dtype),
        grid=grid,
        in_specs=in_specs,
        out_specs=o_spec,
        compiler_params=pltpu.CompilerParams(
            dimension_semantics=("parallel",),
            vmem_limit_bytes=32 * 1024 * 1024),
        cost_estimate=cost,
    )(*args)

    if P_pad != P:
        out2 = out2[:, :, :P]
    return out2.reshape(B, Cout, H, W)


if __name__ == "__main__":
    # Small shapes consistent with the module (NCHW spectral-conv input).
    B, Cin, Cout, H, W = 4, 4, 8, 8, 16
    ranks = (1, 3, 2, 2, 1)                    # TT boundary ranks = 1
    hidden = W                                 # required by the [:, None] broadcast
    key = jax.random.PRNGKey(0)
    k = jax.random.split(key, 8)

    # TT factors of the (Cin, Cout, H, W) weight tensor (deterministic init).
    f0 = jax.random.normal(k[0], (ranks[0], Cin, ranks[1]), jnp.float32) * 0.3
    f1 = jax.random.normal(k[1], (ranks[1], Cout, ranks[2]), jnp.float32) * 0.3
    f2 = jax.random.normal(k[2], (ranks[2], H, ranks[3]), jnp.float32) * 0.3
    f3 = jax.random.normal(k[3], (ranks[3], W, ranks[4]), jnp.float32) * 0.3

    x = jax.random.normal(k[4], (B, Cin, H, W), jnp.float32)
    # temb batch must equal Cin (see layout note); Dense_0 in_features = tt_weight.shape[0] = Cin.
    temb = jax.random.normal(k[5], (Cin, Cin), jnp.float32)

    # Dense_0 init: default_init() == variance_scaling(1, 'fan_avg', 'uniform'); bias = 0.
    fan_in, fan_out = float(Cin), float(hidden)
    bound = np.sqrt(3.0 / ((fan_in + fan_out) / 2.0))
    dense_w = (jax.random.uniform(k[6], (hidden, Cin), jnp.float32) * 2.0 - 1.0) * bound
    dense_b = jnp.zeros((hidden,), jnp.float32)

    out = contract_tt_forward(x, (f0, f1, f2, f3), temb, dense_w, dense_b)
    out = jax.block_until_ready(out)

    # Reference: exact PyTorch semantics, computed in float64 with numpy.
    xn = np.asarray(x, np.float64)
    tn = np.asarray(temb, np.float64)
    wn = np.asarray(dense_w, np.float64)
    bn = np.asarray(dense_b, np.float64)
    silu = tn / (1.0 + np.exp(-tn))
    inj = silu @ wn.T + bn                           # Dense_0(act(temb)) -> (Cin, W)
    x_mod = xn + inj[:, None]                        # x + Dense_0(act(temb))[:, None]
    ref = np.einsum('abcd,fbg,geh,hci,idj->aecd', x_mod,
                    np.asarray(f0, np.float64), np.asarray(f1, np.float64),
                    np.asarray(f2, np.float64), np.asarray(f3, np.float64))

    assert out.shape == (B, Cout, H, W)
    np.testing.assert_allclose(np.asarray(out, np.float64), ref, rtol=1e-2, atol=1e-2)
    print("KERNEL_OK")
</pallas_src>

<mosaic_0001>
module attributes {stable_mosaic.version = 11 : i64} {
  func.func @kernel(%arg0: i32, %arg1: memref<2x4x128xf32, #tpu.memory_space<vmem>>, %arg2: memref<3x4xf32, #tpu.memory_space<smem>>, %arg3: memref<3x8x128xf32, #tpu.memory_space<vmem>>, %arg4: memref<3x128xf32, #tpu.memory_space<vmem>>, %arg5: memref<2x8x128xf32, #tpu.memory_space<vmem>>) attributes {dimension_semantics = [#tpu.dimension_semantics<parallel>], iteration_bounds = array<i64: 2>, scalar_prefetch = 0 : i64, scratch_operands = 0 : i64, tpu.core_type = #tpu.core_type<tc>, window_params = [{transform_indices = @transform_0, window_bounds = array<i64: 2, 4, 128>}, {transform_indices = @transform_1, window_bounds = array<i64: 3, 4>}, {pipeline_mode = #tpu.pipeline_mode<synchronous>, transform_indices = @transform_2, window_bounds = array<i64: 3, 8, 128>}, {pipeline_mode = #tpu.pipeline_mode<synchronous>, transform_indices = @transform_3, window_bounds = array<i64: 3, 128>}, {transform_indices = @transform_4, window_bounds = array<i64: 2, 8, 128>}]} {
    %c0 = arith.constant 0 : index
    %c0_0 = arith.constant 0 : index
    %c0_1 = arith.constant 0 : index
    %0 = vector.load %arg1[%c0, %c0_0, %c0_1] : memref<2x4x128xf32, #tpu.memory_space<vmem>>, vector<2x4x128xf32>
    %c0_2 = arith.constant 0 : index
    %c0_3 = arith.constant 0 : index
    %c0_4 = arith.constant 0 : index
    %1 = vector.load %arg3[%c0_2, %c0_3, %c0_4] : memref<3x8x128xf32, #tpu.memory_space<vmem>>, vector<3x8x128xf32>
    %2 = vector.extract_strided_slice %0 {offsets = [0, 0, 0], sizes = [2, 1, 128], strides = [1, 1, 1]} : vector<2x4x128xf32> to vector<2x1x128xf32>
    %3 = vector.shape_cast %2 : vector<2x1x128xf32> to vector<2x128xf32>
    %4 = vector.extract_strided_slice %0 {offsets = [0, 1, 0], sizes = [2, 1, 128], strides = [1, 1, 1]} : vector<2x4x128xf32> to vector<2x1x128xf32>
    %5 = vector.shape_cast %4 : vector<2x1x128xf32> to vector<2x128xf32>
    %6 = vector.extract_strided_slice %0 {offsets = [0, 2, 0], sizes = [2, 1, 128], strides = [1, 1, 1]} : vector<2x4x128xf32> to vector<2x1x128xf32>
    %7 = vector.shape_cast %6 : vector<2x1x128xf32> to vector<2x128xf32>
    %8 = vector.extract_strided_slice %0 {offsets = [0, 3, 0], sizes = [2, 1, 128], strides = [1, 1, 1]} : vector<2x4x128xf32> to vector<2x1x128xf32>
    %9 = vector.shape_cast %8 : vector<2x1x128xf32> to vector<2x128xf32>
    %c0_5 = arith.constant 0 : index
    %c0_6 = arith.constant 0 : index
    %10 = memref.load %arg2[%c0_5, %c0_6] : memref<3x4xf32, #tpu.memory_space<smem>>
    %11 = vector.broadcast %10 : f32 to vector<2x128xf32>
    %12 = arith.mulf %11, %3 : vector<2x128xf32>
    %c0_7 = arith.constant 0 : index
    %c1 = arith.constant 1 : index
    %13 = memref.load %arg2[%c0_7, %c1] : memref<3x4xf32, #tpu.memory_space<smem>>
    %14 = vector.broadcast %13 : f32 to vector<2x128xf32>
    %15 = arith.mulf %14, %5 : vector<2x128xf32>
    %16 = arith.addf %12, %15 : vector<2x128xf32>
    %c0_8 = arith.constant 0 : index
    %c2 = arith.constant 2 : index
    %17 = memref.load %arg2[%c0_8, %c2] : memref<3x4xf32, #tpu.memory_space<smem>>
    %18 = vector.broadcast %17 : f32 to vector<2x128xf32>
    %19 = arith.mulf %18, %7 : vector<2x128xf32>
    %20 = arith.addf %16, %19 : vector<2x128xf32>
    %c0_9 = arith.constant 0 : index
    %c3 = arith.constant 3 : index
    %21 = memref.load %arg2[%c0_9, %c3] : memref<3x4xf32, #tpu.memory_space<smem>>
    %22 = vector.broadcast %21 : f32 to vector<2x128xf32>
    %23 = arith.mulf %22, %9 : vector<2x128xf32>
    %24 = arith.addf %20, %23 : vector<2x128xf32>
    %c1_10 = arith.constant 1 : index
    %c0_11 = arith.constant 0 : index
    %25 = memref.load %arg2[%c1_10, %c0_11] : memref<3x4xf32, #tpu.memory_space<smem>>
    %26 = vector.broadcast %25 : f32 to vector<2x128xf32>
    %27 = arith.mulf %26, %3 : vector<2x128xf32>
    %c1_12 = arith.constant 1 : index
    %c1_13 = arith.constant 1 : index
    %28 = memref.load %arg2[%c1_12, %c1_13] : memref<3x4xf32, #tpu.memory_space<smem>>
    %29 = vector.broadcast %28 : f32 to vector<2x128xf32>
    %30 = arith.mulf %29, %5 : vector<2x128xf32>
    %31 = arith.addf %27, %30 : vector<2x128xf32>
    %c1_14 = arith.constant 1 : index
    %c2_15 = arith.constant 2 : index
    %32 = memref.load %arg2[%c1_14, %c2_15] : memref<3x4xf32, #tpu.memory_space<smem>>
    %33 = vector.broadcast %32 : f32 to vector<2x128xf32>
    %34 = arith.mulf %33, %7 : vector<2x128xf32>
    %35 = arith.addf %31, %34 : vector<2x128xf32>
    %c1_16 = arith.constant 1 : index
    %c3_17 = arith.constant 3 : index
    %36 = memref.load %arg2[%c1_16, %c3_17] : memref<3x4xf32, #tpu.memory_space<smem>>
    %37 = vector.broadcast %36 : f32 to vector<2x128xf32>
    %38 = arith.mulf %37, %9 : vector<2x128xf32>
    %39 = arith.addf %35, %38 : vector<2x128xf32>
    %c2_18 = arith.constant 2 : index
    %c0_19 = arith.constant 0 : index
    %40 = memref.load %arg2[%c2_18, %c0_19] : memref<3x4xf32, #tpu.memory_space<smem>>
    %41 = vector.broadcast %40 : f32 to vector<2x128xf32>
    %42 = arith.mulf %41, %3 : vector<2x128xf32>
    %c2_20 = arith.constant 2 : index
    %c1_21 = arith.constant 1 : index
    %43 = memref.load %arg2[%c2_20, %c1_21] : memref<3x4xf32, #tpu.memory_space<smem>>
    %44 = vector.broadcast %43 : f32 to vector<2x128xf32>
    %45 = arith.mulf %44, %5 : vector<2x128xf32>
    %46 = arith.addf %42, %45 : vector<2x128xf32>
    %c2_22 = arith.constant 2 : index
    %c2_23 = arith.constant 2 : index
    %47 = memref.load %arg2[%c2_22, %c2_23] : memref<3x4xf32, #tpu.memory_space<smem>>
    %48 = vector.broadcast %47 : f32 to vector<2x128xf32>
    %49 = arith.mulf %48, %7 : vector<2x128xf32>
    %50 = arith.addf %46, %49 : vector<2x128xf32>
    %c2_24 = arith.constant 2 : index
    %c3_25 = arith.constant 3 : index
    %51 = memref.load %arg2[%c2_24, %c3_25] : memref<3x4xf32, #tpu.memory_space<smem>>
    %52 = vector.broadcast %51 : f32 to vector<2x128xf32>
    %53 = arith.mulf %52, %9 : vector<2x128xf32>
    %54 = arith.addf %50, %53 : vector<2x128xf32>
    %c0_26 = arith.constant 0 : index
    %c0_27 = arith.constant 0 : index
    %55 = vector.load %arg4[%c0_26, %c0_27] : memref<3x128xf32, #tpu.memory_space<vmem>>, vector<3x128xf32>
    %56 = vector.extract_strided_slice %55 {offsets = [0, 0], sizes = [1, 128], strides = [1, 1]} : vector<3x128xf32> to vector<1x128xf32>
    %57 = vector.broadcast %56 : vector<1x128xf32> to vector<2x128xf32>
    %58 = arith.addf %24, %57 : vector<2x128xf32>
    %59 = vector.extract_strided_slice %55 {offsets = [1, 0], sizes = [1, 128], strides = [1, 1]} : vector<3x128xf32> to vector<1x128xf32>
    %60 = vector.broadcast %59 : vector<1x128xf32> to vector<2x128xf32>
    %61 = arith.addf %39, %60 : vector<2x128xf32>
    %62 = vector.extract_strided_slice %55 {offsets = [2, 0], sizes = [1, 128], strides = [1, 1]} : vector<3x128xf32> to vector<1x128xf32>
    %63 = vector.broadcast %62 : vector<1x128xf32> to vector<2x128xf32>
    %64 = arith.addf %54, %63 : vector<2x128xf32>
    %65 = vector.shape_cast %58 : vector<2x128xf32> to vector<2x1x128xf32>
    %66 = vector.extract_strided_slice %1 {offsets = [0, 0, 0], sizes = [1, 8, 128], strides = [1, 1, 1]} : vector<3x8x128xf32> to vector<1x8x128xf32>
    %67 = vector.shape_cast %66 : vector<1x8x128xf32> to vector<8x128xf32>
    %68 = vector.shape_cast %67 : vector<8x128xf32> to vector<1x8x128xf32>
    %69 = vector.broadcast %65 : vector<2x1x128xf32> to vector<2x8x128xf32>
    %70 = vector.broadcast %68 : vector<1x8x128xf32> to vector<2x8x128xf32>
    %71 = arith.mulf %69, %70 : vector<2x8x128xf32>
    %72 = vector.shape_cast %61 : vector<2x128xf32> to vector<2x1x128xf32>
    %73 = vector.extract_strided_slice %1 {offsets = [1, 0, 0], sizes = [1, 8, 128], strides = [1, 1, 1]} : vector<3x8x128xf32> to vector<1x8x128xf32>
    %74 = vector.shape_cast %73 : vector<1x8x128xf32> to vector<8x128xf32>
    %75 = vector.shape_cast %74 : vector<8x128xf32> to vector<1x8x128xf32>
    %76 = vector.broadcast %72 : vector<2x1x128xf32> to vector<2x8x128xf32>
    %77 = vector.broadcast %75 : vector<1x8x128xf32> to vector<2x8x128xf32>
    %78 = arith.mulf %76, %77 : vector<2x8x128xf32>
    %79 = arith.addf %71, %78 : vector<2x8x128xf32>
    %80 = vector.shape_cast %64 : vector<2x128xf32> to vector<2x1x128xf32>
    %81 = vector.extract_strided_slice %1 {offsets = [2, 0, 0], sizes = [1, 8, 128], strides = [1, 1, 1]} : vector<3x8x128xf32> to vector<1x8x128xf32>
    %82 = vector.shape_cast %81 : vector<1x8x128xf32> to vector<8x128xf32>
    %83 = vector.shape_cast %82 : vector<8x128xf32> to vector<1x8x128xf32>
    %84 = vector.broadcast %80 : vector<2x1x128xf32> to vector<2x8x128xf32>
    %85 = vector.broadcast %83 : vector<1x8x128xf32> to vector<2x8x128xf32>
    %86 = arith.mulf %84, %85 : vector<2x8x128xf32>
    %87 = arith.addf %79, %86 : vector<2x8x128xf32>
    %c0_28 = arith.constant 0 : index
    %c0_29 = arith.constant 0 : index
    %c0_30 = arith.constant 0 : index
    %88 = vector.load %arg5[%c0_28, %c0_29, %c0_30] : memref<2x8x128xf32, #tpu.memory_space<vmem>>, vector<2x8x128xf32>
    tpu.vector_store %arg5[%c0_28, %c0_29, %c0_30], %87 {strides = array<i32>} : memref<2x8x128xf32, #tpu.memory_space<vmem>>, vector<2x8x128xf32>,
    return
  }
  func.func @transform_0(%arg0: i32) -> (i32, i32, i32) {
    %c0_i32 = arith.constant 0 : i32
    %c0_i32_0 = arith.constant 0 : i32
    %c0_i32_1 = arith.constant 0 : i32
    return %arg0, %c0_i32, %c0_i32_0 : i32, i32, i32
  }
  func.func @transform_1(%arg0: i32) -> (i32, i32) {
    %c0_i32 = arith.constant 0 : i32
    %c0_i32_0 = arith.constant 0 : i32
    %c0_i32_1 = arith.constant 0 : i32
    return %c0_i32, %c0_i32_0 : i32, i32
  }
  func.func @transform_2(%arg0: i32) -> (i32, i32, i32) {
    %c0_i32 = arith.constant 0 : i32
    %c0_i32_0 = arith.constant 0 : i32
    %c0_i32_1 = arith.constant 0 : i32
    %c0_i32_2 = arith.constant 0 : i32
    return %c0_i32, %c0_i32_0, %c0_i32_1 : i32, i32, i32
  }
  func.func @transform_3(%arg0: i32) -> (i32, i32) {
    %c0_i32 = arith.constant 0 : i32
    %c0_i32_0 = arith.constant 0 : i32
    %c0_i32_1 = arith.constant 0 : i32
    return %c0_i32, %c0_i32_0 : i32, i32
  }
  func.func @transform_4(%arg0: i32) -> (i32, i32, i32) {
    %c0_i32 = arith.constant 0 : i32
    %c0_i32_0 = arith.constant 0 : i32
    %c0_i32_1 = arith.constant 0 : i32
    return %arg0, %c0_i32, %c0_i32_0 : i32, i32, i32
  }
}

</mosaic_0001>

<bundles_post_ra>
// kernel: tpu_custom_call.1
= control target key start
LH: loop header
LB: loop body
LE: loop exit
PB: predicated region body
PF: predicated region fallthrough
CT: control target
= control target key end

     0   :  { %s1121_s0 = inlined_call_operand.hbm [shape: f32[4,4,128], index: 0, kind: input, shape index: {}]   ;;  %s1122_s1 = inlined_call_operand.hbm [shape: f32[3,4], index: 1, kind: input, shape index: {}]   ;;  %s1123_s2 = inlined_call_operand.hbm [shape: f32[3,8,128], index: 2, kind: input, shape index: {}]   ;;  %s1124_s3 = inlined_call_operand.vmem [shape: f32[3,128], index: 3, kind: input, shape index: {}]   ;;  %s1125_s4 = inlined_call_operand.hbm [shape: f32[4,8,128], index: 4, kind: output, shape index: {}]  }
   0x1   :  { %1131 = sst [smem:[#allocation14_spill]] %s1122_s1 }
   0x2   :  { %9 = vsyncpa [#allocation3], 0 }
   0x3   :  { %11 = vsyncpa [#allocation3 + $0x1], 0 }
   0x4   :  { %12 = vsyncpa [#allocation5], 0 }
   0x5   :  { %13 = vsyncpa [#allocation8], 0 }
   0x6   :  { %14 = vsyncpa [#allocation4], 0 }
   0x7   :  { %16 = vsyncpa [#allocation4 + $0x1], 0  ;;  %s820_s15 = smov 0   ;;  %s822_s16 = smov 0  }
   0x8   :  { %s824_s17 = smov 0   ;;  %s826_s18 = smov 0  }
   0x9 LB: > { %s841_s19 = sadd.s32 4294967295, %s783_s18   ;;  %s534_s20 = sadd.s32 4294967294, %s783_s18   ;;  %s783_s18 = sphi %s826_s18, %s1155_s18   ;;  %s779_s17 = sphi %s824_s17, %s1154_s17   ;;  %s775_s16 = sphi %s822_s16, %s1153_s16   ;;  %s771_s15 = sphi %s820_s15, %s1152_s15  }
   0xa   : > { %s845_s21 = sadd.s32 1, %s783_s18   ;;  %s29_s22 = sadd.s32 1, %s779_s17 }
   0xb   : > { %s26_s23 = ssub.s32 %s783_s18, %s845_s21  ;;  %p36_p0 = scmp.ne.s32.totalorder %s779_s17, %s775_s16 }
   0xc   : > { %p27_p1 = scmp.eq.s32.totalorder %s26_s23, 0  ;;  %p37_p2 = scmp.eq.s32.totalorder %s783_s18, 0 }
   0xd   : > { %p42_p3 = scmp.ne.s32.totalorder %s775_s16, %s771_s15  ;;  %p1126_p4 = scmp.eq.s32.totalorder %s841_s19, 0 }
   0xe   : > { %s857_s24 = scalar_select %p27_p1, %s779_s17, %s29_s22  }
   0xf   : > { %p859_p5 = por %p37_p2, %p36_p0  ;;  %p865_p6 = por %p1126_p4, %p42_p3 }
  0x10   : > { %p129_p7 = scmp.eq.s32.totalorder %s841_s19, 1  ;;  %p135_p8 = scmp.eq.s32.totalorder %s534_s20, 1 }
  0x11   : > { %s1132_s25 = scalar_select %p859_p5, 1, 0 }
  0x12   : > { %s1133_s26 = scalar_select %p865_p6, 1, 0 }
  0x13   : > { %p535_p9 = scmp.ge.s32.totalorder %s783_s18, 1  ;;  %p142_p10 = scmp.lt.s32.totalorder %s783_s18, 3 }
  0x14   : > { %p872_p11 = por %p129_p7, %p36_p0  ;;  %p876_p12 = por %p135_p8, %p42_p3 }
  0x15   : > { %p880_p13 = pnand %p535_p9, %p142_p10  ;;  %p594_p4 = scmp.lt.s32.totalorder %s783_s18, 2 }
  0x16   : > { %s1134_s27 = scalar_select %p872_p11, 1, 0 }
  0x17   : > { %s1135_s28 = scalar_select %p876_p12, 1, 0 }
  0x18   : > { %s1136_s29 = scalar_select %p880_p13, 1, 0 }
  0x19   : > { %p577_p2 = pneg %p880_p13  ;;  %p1137_p6 = scmp.eq.s32.totalorder %s841_s19, 0 }
  0x1a   : > { %p1139_p0 = scmp.ne.s32.totalorder %s1132_s25, 0  ;;  %s785_s6 = smov [#allocation7]  }
  0x1b   : > { %p890_p5 = pnand %p577_p2, %p1137_p6  ;;  %s163_s7 = sshll.u32 %s785_s6, 4  ;;  %s164_s7 = int_to_ptr.vmem [resolvable:$true] %s163_s7 }
  0x1c   : > { %p896_p3 = pnand %p594_p4, %p1139_p0  ;;  %s1141_s1 = sld [smem:[#allocation14_spill]] }
  0x1d   : > { %p640_p7 = pneg %p890_p5 }
  0x1e   : > { %s1140_s5 = scalar_select %p896_p3, 1, 0 }
  0x22   : > { %s638_s10 = scalar_lea.hbm %s1141_s1, 64 }
  0x23   : > { %p639_p6 = scmp.ne.s32.totalorder %s1141_s1, %s638_s10  ;;  %p645_p4 = scmp.lt.u32.totalorder %s638_s10, %s1141_s1 }
  0x25   : > { %p641_p8 = pnand %p640_p7, %p639_p6 }
  0x27   : > { %p642_p9 = pneg %p641_p8 }
  0x29   : > { %p647_p10 = pnand %p645_p4, %p642_p9 }
  0x2b   : > { %650 = shalt.err (!%p647_p10)
}
  0x2c   : > { %s786_s20 = smov [#allocation6]   ;;  %s180_s25 = sand.u32 1, %s779_s17  }
  0x2d   : > { %580 = dma.hbm_to_smem (!%p890_p5), %s1141_s1, 64, %s786_s20, [#allocation5]  }
  0x2e   : > { %s651_s9 = scalar_lea.hbm %s1123_s2, 384 }
  0x2f   : > { %p652_p2 = scmp.ne.s32.totalorder %s1123_s2, %s651_s9  ;;  %p658_p8 = scmp.lt.u32.totalorder %s651_s9, %s1123_s2 }
  0x31   : > { %p654_p0 = pnand %p652_p2, %p640_p7 }
  0x33   : > { %p655_p6 = pneg %p654_p0 }
  0x35   : > { %p660_p9 = pnand %p658_p8, %p655_p6 }
  0x37   : > { %663 = shalt.err (!%p660_p9)
}
  0x38   : > { %s664_s14 = scalar_lea.vmem %s164_s7, 384  ;;  %p672_p12 = scmp.lt.s32.totalorder %s164_s7, %s164_s7 }
  0x39   : > { %p665_p4 = scmp.ne.s32.totalorder %s164_s7, %s664_s14  ;;  %p673_p11 = scmp.lt.s32.totalorder %s664_s14, %s664_s14 }
  0x3b   : > { %p667_p10 = pnand %p665_p4, %p640_p7  ;;  %p674_p13 = por %p673_p11, %p672_p12 }
  0x3d   : > { %p668_p1 = pneg %p667_p10 }
  0x3f   : > { %p675_p3 = pnand %p674_p13, %p668_p1 }
  0x41   : > { %678 = shalt.err (!%p675_p3)
}
  0x42   : > { %s787_s20 = smov 128   ;;  %s788_s22 = smov 8  }
  0x43   : > { %583 = dma.hbm_to_vmem [thread:$0]  (!%p890_p5), %s1123_s2, 384, %s164_s7, [#allocation8], %s787_s20, %s787_s20, %s788_s22  }
  0x44   : > { %s539_s8 = sshll.u32 %s180_s25, 3  ;;  %s563_s9 = sshll.u32 %s783_s18, 7 }
  0x45   : > { %s944_s10 = scalar_lea.hbm %s1121_s0, %s563_s9  ;;  %s184_s13 = scalar_lea.vmem [#allocation2], %s539_s8 }
  0x46   : > { %s191_s14 = sshll.u32 %s184_s13, 4  ;;  %s948_s30 = scalar_lea.sflag [#allocation3], %s180_s25  ;;  %s946_s14 = int_to_ptr.vmem [resolvable:$true] %s191_s14 }
  0x47   : > { %s679_s1 = scalar_lea.hbm %s944_s10, 128  ;;  %p1142_p5 = scmp.ne.s32.totalorder %s1140_s5, 0 }
  0x48   : > { %p680_p11 = scmp.ne.s32.totalorder %s944_s10, %s679_s1  ;;  %s684_s22 = scalar_lea.hbm %s1121_s0, 256 }
  0x49   : > { %p681_p12 = pneg %p1142_p5  ;;  %p685_p3 = scmp.lt.u32.totalorder %s944_s10, %s1121_s0 }
  0x4a   : > { %p686_p7 = scmp.lt.u32.totalorder %s684_s22, %s679_s1  ;;  %p688_p0 = scmp.lt.u32.totalorder %s679_s1, %s944_s10 }
  0x4b   : > { %p682_p13 = pnand %p681_p12, %p680_p11 }
  0x4c   : > { %p687_p2 = por %p686_p7, %p685_p3 }
  0x4d   : > { %p683_p1 = pneg %p682_p13 }
  0x4e   : > { %p689_p6 = por %p688_p0, %p687_p2 }
  0x50   : > { %p690_p8 = pnand %p689_p6, %p683_p1 }
  0x52   : > { %693 = shalt.err (!%p690_p8)
}
  0x53   : > { %s694_s25 = scalar_lea.vmem %s946_s14, 128  ;;  %s789_s8 = smov [#allocation2]  }
  0x54   : > { %p695_p9 = scmp.ne.s32.totalorder %s946_s14, %s694_s25  ;;  %s699_s9 = sshll.u32 %s789_s8, 4  ;;  %s700_s9 = int_to_ptr.vmem [resolvable:$false] %s699_s9 }
  0x55   : > { %s701_s11 = scalar_lea.vmem %s700_s9, 256  ;;  %p702_p11 = scmp.lt.s32.totalorder %s946_s14, %s700_s9 }
  0x56   : > { %p697_p4 = pnand %p695_p9, %p681_p12  ;;  %p703_p13 = scmp.lt.s32.totalorder %s701_s11, %s694_s25 }
  0x58   : > { %p698_p10 = pneg %p697_p4  ;;  %p704_p3 = por %p703_p13, %p702_p11 }
  0x5a   : > { %p705_p7 = pnand %p704_p3, %p698_p10 }
  0x5c   : > { %708 = shalt.err (!%p705_p7)
}
  0x5d   : > { %s790_s1 = smov 64   ;;  %s791_s12 = smov 4  }
  0x5e   : > { %587 = dma.hbm_to_vmem [thread:$0]  (!%p1142_p5), %s944_s10, 128, %s946_s14, %s948_s30, %s790_s1, %s790_s1, %s791_s12  }
  0x5f   : > { %p1143_p12 = scmp.ne.s32.totalorder %s1136_s29, 0 }
  0x60   : > { %s979_s13 = sand.u32 (!%p1143_p12), 1, %s775_s16   ;;  %p1144_p1 = scmp.ne.s32.totalorder (!%p1143_p12), %s1133_s26, 0 }
  0x61   : > { %203 = sbr.rel (%p1143_p12) target bundleno = 170 (0xaa), region = 36  ;;  %s543_s7 = sshll.u32 (!%p1143_p12), %s979_s13, 3 }
  0x62   : > { %s206_s20 = scalar_lea.sflag (!%p1143_p12), [#allocation3], %s979_s13  ;;  %s983_s22 = scalar_lea.vmem (!%p1143_p12), [#allocation2], %s543_s7 }
  0x68   : > { %754 = dma.done.wait (%p1144_p1), %s206_s20, 128  }
  0x69   : > { %756 = vsyncadd (%p1144_p1), %s206_s20, 4294967168  ;;  %p1145_p5 = scmp.eq.s32.totalorder %s841_s19, 0 }
  0x6b   : > { %758 = dma.done.wait (%p1145_p5), [#allocation5], 64   ;;  %p1146_p2 = pmov %p1145_p5 }
  0x6d   : > { %760 = vsyncadd (%p1146_p2), [#allocation5], 4294967232  ;;  %p1147_p0 = pmov %p1146_p2 }
  0x6f   : > { %762 = dma.done.wait (%p1147_p0), [#allocation8], 384   ;;  %p1148_p6 = pmov %p1147_p0 }
  0x71   : > { %764 = vsyncadd (%p1148_p6), [#allocation8], 4294966912 }
  0x72   : > { %222 = sfence }
  0x73   : > { %v371_v0 = vlaneseq  ;;  %s250_s29 = sld [smem:[#allocation6]]  ;;  %s997_s5 = sld [smem:[#allocation6 + $0x1]]  ;;  %v370_v2 = vld [vmem:[%s1124_s3] sm:$0x7]  ;;  %v1033_v11 = vld [vmem:[%s983_s22 + $0x4] sm:$0xf] }
  0x74   : > { %s999_s26 = sld [smem:[#allocation6 + $0x2]]  ;;  %s1001_s10 = sld [smem:[#allocation6 + $0x3]]  ;;  %v245_v6 = vld [vmem:[%s983_s22] sm:$0xf]  ;;  %v247_v60 = vld [vmem:[#allocation7] sm:$0xff] }
  0x75   : > { %v372_v1 = vshrl.u32 %v371_v0, 7  ;;  %s1003_s14 = sld [smem:[#allocation6 + $0x80]]  ;;  %s1008_s6 = sld [smem:[#allocation6 + $0x81]] }
  0x76   : > { %s1010_s25 = sld [smem:[#allocation6 + $0x82]]  ;;  %s1014_s8 = sld [smem:[#allocation6 + $0x83]] }
  0x77   : > { %v1012_v3 = vsub.s32 0, %v372_v1  ;;  %v379_v4 = vsub.s32 1, %v372_v1  ;;  %s1016_s9 = sld [smem:[#allocation6 + $0x100]]  ;;  %v385_v5 = vsub.s32 2, %v372_v1  ;;  %s1019_s11 = sld [smem:[#allocation6 + $0x101]] }
  0x78   : > { %s1021_s1 = sld [smem:[#allocation6 + $0x102]]  ;;  %s1023_s12 = sld [smem:[#allocation6 + $0x103]] }
  0x79   : > { %v251_v7 = vstv %s250_s29  ;;  %v1026_v8 = vrot.slane %v370_v2, %v1012_v3  ;;  %v1028_v9 = vrot.slane %v370_v2, %v379_v4  ;;  %v1030_v10 = vrot.slane %v370_v2, %v385_v5  ;;  %s546_s7 = sshll.u32 %s979_s13, 4  ;;  %s564_s29 = sshll.u32 %s841_s19, 8 }
  0x7a   : > { %v252_v12 = vmul.f32 %v251_v7, %v245_v6  ;;  %v255_v13 = vstv %s997_s5  ;;  %v267_v14 = vstv %s999_s26  ;;  %v253_v15 = vmul.f32 %v251_v7, %v1033_v11  ;;  %s242_s20 = scalar_lea.vmem [#allocation9], %s546_s7  ;;  %p1149_p9 = scmp.ne.s32.totalorder %s1134_s27, 0 }
  0x7b   : > { %v256_v16 = vmul.f32 %v255_v13, %v245_v6  ;;  %v268_v17 = vmul.f32 %v267_v14, %v245_v6  ;;  %v279_v18 = vstv %s1001_s10  ;;  %v291_v19 = vstv %s1003_s14  ;;  %s439_s22 = sshll.u32 %s242_s20, 4  ;;  %s1077_s10 = scalar_lea.hbm %s1125_s4, %s564_s29  ;;  %s1072_s22 = int_to_ptr.vmem [resolvable:$true] %s439_s22 }
  0x7c   : > { %v280_v20 = vmul.f32 %v279_v18, %v245_v6  ;;  %v292_v21 = vmul.f32 %v291_v19, %v245_v6  ;;  %v295_v22 = vstv %s1008_s6  ;;  %v307_v23 = vstv %s1010_s25  ;;  %s426_s14 = scalar_lea.sflag [#allocation4], %s979_s13  ;;  %s709_s30 = scalar_lea.vmem %s1072_s22, 256 }
  0x7d   : > { %v260_v24 = vrot.slane %v256_v16, 1  ;;  %v272_v25 = vrot.slane %v268_v17, 2  ;;  %v296_v26 = vmul.f32 %v295_v22, %v245_v6  ;;  %v308_v27 = vmul.f32 %v307_v23, %v245_v6  ;;  %p710_p8 = scmp.ne.s32.totalorder %s1072_s22, %s709_s30  ;;  %s792_s19 = smov [#allocation9]  }
  0x7e   : > { %v284_v28 = vrot.slane %v280_v20, 3  ;;  %v319_v29 = vstv %s1014_s8  ;;  %v331_v30 = vstv %s1016_s9  ;;  %v335_v31 = vstv %s1019_s11  ;;  %s713_s23 = sshll.u32 %s792_s19, 4  ;;  %s714_s23 = int_to_ptr.vmem [resolvable:$false] %s713_s23 }
  0x7f   : > { %v264_v32 = vadd.f32 %v260_v24, %v252_v12  ;;  %v300_v33 = vrot.slane %v296_v26, 1  ;;  %v312_v34 = vrot.slane %v308_v27, 2  ;;  %v320_v35 = vmul.f32 %v319_v29, %v245_v6  ;;  %p711_p4 = pnand %p710_p8, %p1149_p9  ;;  %s715_s6 = scalar_lea.vmem %s714_s23, 512 }
  0x80   : > { %v332_v36 = vmul.f32 %v331_v30, %v245_v6  ;;  %v336_v37 = vmul.f32 %v335_v31, %v245_v6  ;;  %v347_v38 = vstv %s1021_s1  ;;  %v359_v39 = vstv %s1023_s12  ;;  %p716_p11 = scmp.lt.s32.totalorder %s1072_s22, %s714_s23  ;;  %p717_p13 = scmp.lt.s32.totalorder %s715_s6, %s709_s30 }
  0x81   : > { %v276_v40 = vadd.f32 %v272_v25, %v264_v32  ;;  %v304_v41 = vadd.f32 %v300_v33, %v292_v21  ;;  %v324_v42 = vrot.slane %v320_v35, 3  ;;  %v348_v43 = vmul.f32 %v347_v38, %v245_v6  ;;  %p712_p10 = pneg %p711_p4 }
  0x82   : > { %v340_v44 = vrot.slane %v336_v37, 1  ;;  %v360_v45 = vmul.f32 %v359_v39, %v245_v6  ;;  %v257_v46 = vmul.f32 %v255_v13, %v1033_v11  ;;  %v269_v47 = vmul.f32 %v267_v14, %v1033_v11  ;;  %v248_v6 = vld [vmem:[#allocation7 + $0x8] sm:$0xff]  ;;  %p718_p3 = por %p717_p13, %p716_p11 }
  0x83   : > { %v288_v48 = vadd.f32 %v284_v28, %v276_v40  ;;  %v316_v49 = vadd.f32 %v312_v34, %v304_v41  ;;  %v352_v50 = vrot.slane %v348_v43, 2  ;;  %v281_v51 = vmul.f32 %v279_v18, %v1033_v11 }
  0x84   : > { %v344_v52 = vadd.f32 %v340_v44, %v332_v36  ;;  %v364_v53 = vrot.slane %v360_v45, 3  ;;  %v261_v54 = vrot.slane %v257_v46, 1  ;;  %v273_v55 = vrot.slane %v269_v47, 2  ;;  %p719_p7 = pnand %p718_p3, %p712_p10 }
  0x85   : > { %v328_v56 = vadd.f32 %v324_v42, %v316_v49  ;;  %v375_v57 = vadd.f32 %v1026_v8, %v288_v48  ;;  %v285_v58 = vrot.slane %v281_v51, 3  ;;  %v293_v59 = vmul.f32 %v291_v19, %v1033_v11 }
  0x86   : > { %v356_v61 = vadd.f32 %v352_v50, %v344_v52  ;;  %v265_v62 = vadd.f32 %v261_v54, %v253_v15  ;;  %v297_v63 = vmul.f32 %v295_v22, %v1033_v11  ;;  %v309_v0 = vmul.f32 %v307_v23, %v1033_v11  ;;  %v249_v23 = vld [vmem:[#allocation7 + $0x10] sm:$0xff] }
  0x87   : > { %v381_v1 = vadd.f32 %v1028_v9, %v328_v56  ;;  %v392_v2 = vrot.slane %v375_v57, %v1012_v3  ;;  %v321_v4 = vmul.f32 %v319_v29, %v1033_v11  ;;  %v333_v5 = vmul.f32 %v331_v30, %v1033_v11 }
  0x88   : > { %v368_v7 = vadd.f32 %v364_v53, %v356_v61  ;;  %v277_v12 = vadd.f32 %v273_v55, %v265_v62  ;;  %v301_v13 = vrot.slane %v297_v63, 1  ;;  %v313_v14 = vrot.slane %v309_v0, 2 }
  0x89   : > { %v397_v16 = vmul.f32 %v392_v2, %v247_v60  ;;  %v402_v15 = vrot.slane %v381_v1, %v1012_v3  ;;  %v325_v17 = vrot.slane %v321_v4, 3  ;;  %v337_v18 = vmul.f32 %v335_v31, %v1033_v11 }
  0x8a   : > { %v387_v19 = vadd.f32 %v1030_v10, %v368_v7  ;;  %v289_v20 = vadd.f32 %v285_v58, %v277_v12  ;;  %v305_v21 = vadd.f32 %v301_v13, %v293_v59  ;;  %v349_v22 = vmul.f32 %v347_v38, %v1033_v11 }
  0x8b   : > { %v407_v24 = vmul.f32 %v402_v15, %v248_v6  ;;  %v341_v25 = vrot.slane %v337_v18, 1  ;;  %v361_v26 = vmul.f32 %v359_v39, %v1033_v11 }
  0x8c   : > { %v414_v27 = vrot.slane %v387_v19, %v1012_v3  ;;  %v317_v28 = vadd.f32 %v313_v14, %v305_v21  ;;  %v353_v29 = vrot.slane %v349_v22, 2  ;;  %v376_v30 = vadd.f32 %v1026_v8, %v289_v20 }
  0x8d   : > { %v409_v32 = vadd.f32 %v407_v24, %v397_v16  ;;  %v345_v31 = vadd.f32 %v341_v25, %v333_v5  ;;  %v365_v33 = vrot.slane %v361_v26, 3 }
  0x8e   : > { %v419_v34 = vmul.f32 %v414_v27, %v249_v23  ;;  %v329_v35 = vadd.f32 %v325_v17, %v317_v28  ;;  %v396_v36 = vrot.slane %v376_v30, %v1012_v3 }
  0x8f   : > { %v357_v37 = vadd.f32 %v353_v29, %v345_v31 }
  0x90   : > { %v421_v38 = vadd.f32 %v419_v34, %v409_v32  ;;  %v382_v40 = vadd.f32 %v1028_v9, %v329_v35  ;;  %v398_v39 = vmul.f32 %v396_v36, %v247_v60 }
  0x91   : > { %v369_v11 = vadd.f32 %v365_v33, %v357_v37 }
  0x92   : > { %423 = vst [vmem:[%s242_s20] sm:$0xff] %v421_v38  ;;  %v406_v8 = vrot.slane %v382_v40, %v1012_v3 }
  0x93   : > { %v388_v41 = vadd.f32 %v1030_v10, %v369_v11 }
  0x94   : > { %v408_v42 = vmul.f32 %v406_v8, %v248_v6 }
  0x95   : > { %v418_v43 = vrot.slane %v388_v41, %v1012_v3 }
  0x96   : > { %v410_v44 = vadd.f32 %v408_v42, %v398_v39 }
  0x97   : > { %v420_v45 = vmul.f32 %v418_v43, %v249_v23 }
  0x99   : > { %v422_v9 = vadd.f32 %v420_v45, %v410_v44 }
  0x9b   : > { %424 = vst [vmem:[%s242_s20 + $0x8] sm:$0xff] %v422_v9 }
  0x9c   : > { %722 = shalt.err (!%p719_p7)
}
  0x9d   : > { %s723_s25 = scalar_lea.hbm %s1077_s10, 256  ;;  %s727_s11 = scalar_lea.hbm %s1125_s4, 512 }
  0x9e   : > { %p724_p12 = scmp.ne.s32.totalorder %s1077_s10, %s723_s25  ;;  %p728_p2 = scmp.lt.u32.totalorder %s1077_s10, %s1125_s4 }
  0x9f   : > { %p729_p0 = scmp.lt.u32.totalorder %s727_s11, %s723_s25  ;;  %p731_p8 = scmp.lt.u32.totalorder %s723_s25, %s1077_s10 }
  0xa0   : > { %p725_p1 = pnand %p724_p12, %p1149_p9 }
  0xa1   : > { %p730_p6 = por %p729_p0, %p728_p2 }
  0xa2   : > { %p726_p5 = pneg %p725_p1 }
  0xa3   : > { %p732_p4 = por %p731_p8, %p730_p6 }
  0xa5   : > { %p733_p10 = pnand %p732_p4, %p726_p5 }
  0xa7   : > { %736 = shalt.err (!%p733_p10)
}
  0xa8   : > { %s793_s7 = smov 128   ;;  %s794_s20 = smov 8  }
  0xa9   : > { %575 = dma.vmem_to_hbm [thread:$0]  (%p1149_p9), %s1072_s22, 256, %s1077_s10, %s426_s14, %s793_s7, %s793_s7, %s794_s20  }
  0xaa PF: > { %s454_s29 = sand.u32 1, %s771_s15   ;;  %p1150_p11 = scmp.ne.s32.totalorder %s1135_s28, 0 }
  0xab   : > { %p1151_p13 = scmp.ge.s32.totalorder %s783_s18, 2  ;;  %s455_s5 = scalar_lea.sflag [#allocation4], %s454_s29 }
  0xad   : > { %p589_p3 = pnand %p1151_p13, %p1150_p11 }
  0xaf   : > { %766 = dma.done.wait (!%p589_p3), %s455_s5, 256  }
  0xb0   : > { %768 = vsyncadd (!%p589_p3), %s455_s5, 4294967040  ;;  %p19_p7 = scmp.ge.s32.totalorder %s845_s21, 4   ;;  %s1152_s15 = smov %s775_s16 }
  0xb1   : > { %s1153_s16 = smov %s779_s17  ;;  %s1154_s17 = smov %s857_s24 }
  0xb2   : > { %s1155_s18 = smov %s845_s21  ;;  %21 = sbr.rel (!%p19_p7) target bundleno = 9 (0x9), region = 90 }
  0xb9   :  { %460 = vsyncpa [#allocation3], 1 }
  0xba   :  { %462 = vsyncpa [#allocation3 + $0x1], 1 }
  0xbb   :  { %463 = vsyncpa [#allocation8], 1 }
  0xbc   :  { %464 = vsyncpa [#allocation4], 1 }
  0xbd   :  { %466 = vsyncpa [#allocation4 + $0x1], 1 }
  0xbe   :  { %467 = vsyncpa [#allocation5], 1 }
  0xbf   :  { %469 = vsyncpa [#allocation5 + $0x1], 1 }

</bundles_post_ra>
